<compile_context>
chip_gen: v7x
topology: tpu7x:2x2x1
jax: 0.10.0
libtpu: 0.0.40
codegen_flags: <defaults>
</compile_context>

<pallas_src>
import functools
import math

import jax
import jax.numpy as jnp
from jax.experimental import pallas as pl
from jax.experimental.pallas import tpu as pltpu


def _round_up(v, m):
    return (v + m - 1) // m * m


def _pad2d(a, rows, cols, dtype):
    out = jnp.zeros((rows, cols), dtype=dtype)
    return out.at[: a.shape[0], : a.shape[1]].set(a.astype(dtype))


def _vmem_budget_bytes():
    """~75% of per-core physical VMEM (v7x: 64 MiB, v5e/v6e: 128 MiB)."""
    cap = 64 * 1024 * 1024  # conservative default = v7x physical
    try:
        cap = int(pltpu.get_tpu_info().vmem_capacity_bytes)
    except Exception:
        pass
    return max(32 * 1024 * 1024, min((cap * 3) // 4, 96 * 1024 * 1024))


def _choose_tiles(n_128, fi, h, c, budget, row_tile, col_tile):
    """Pick (TM, TK) so the double-buffered footprint fits the VMEM budget."""
    tm = min(row_tile, n_128)
    tk = min(col_tile, n_128)

    def footprint(tm_, tk_):
        return (2 * tm_ * tk_ * 1           # adj int8, double-buffered
                + 2 * tk_ * fi * 2          # streamed source features (bf16)
                + 2 * fi * h * 2            # w1 (bf16, resident but 2-buffered)
                + 2 * h * c * 2             # w2 (bf16)
                + 4 * (h + c) * 4           # biases (f32)
                + 2 * tm_ * c * 2           # z output tile (bf16)
                + tm_ * max(fi, c) * 4)     # f32 accumulator scratch

    while footprint(tm, tk) > budget and tk > 128:
        tk = max(128, (tk // 2) // 128 * 128)
    while footprint(tm, tk) > budget and tm > 128:
        tm = max(128, (tm // 2) // 128 * 128)
    return tm, tk


# ---------------------------------------------------------------------------
# Kernels
# ---------------------------------------------------------------------------
def _layer1_fused_kernel(*refs, apply_w1):
    """Row tile i, source tile k:
         acc += adj[i,k] @ feats[k]          (int8 adj -> bf16, f32 accumulate)
       epilogue (k == last):
         h1 = relu((acc [@ w1]) + b1);  z = h1 @ w2;  store z (bf16).
    Layer 2's projection (w2) is fused here so it is computed once per row tile
    instead of being recomputed inside layer 2's row/K grid.
    """
    if apply_w1:
        adj_ref, x_ref, w1_ref, b1_ref, w2_ref, z_ref, acc_ref = refs
    else:
        adj_ref, x_ref, b1_ref, w2_ref, z_ref, acc_ref = refs
        w1_ref = None

    k = pl.program_id(1)

    @pl.when(k == 0)
    def _():
        acc_ref[...] = jnp.zeros_like(acc_ref)

    adj = adj_ref[...].astype(jnp.bfloat16)
    acc_ref[...] += jnp.dot(adj, x_ref[...], preferred_element_type=jnp.float32)

    @pl.when(k == pl.num_programs(1) - 1)
    def _():
        h = acc_ref[...]
        if apply_w1:
            h = jnp.dot(h.astype(jnp.bfloat16), w1_ref[...],
                        preferred_element_type=jnp.float32)
        h = jnp.maximum(h + b1_ref[...], 0.0).astype(jnp.bfloat16)
        z = jnp.dot(h, w2_ref[...], preferred_element_type=jnp.float32)
        z_ref[...] = z.astype(z_ref.dtype)


def _layer2_agg_kernel(adj_ref, z_ref, b_ref, out_ref, acc_ref):
    """Pure aggregation: out = adj @ z + b (projection was fused into layer 1)."""
    k = pl.program_id(1)

    @pl.when(k == 0)
    def _():
        acc_ref[...] = jnp.zeros_like(acc_ref)

    adj = adj_ref[...].astype(jnp.bfloat16)
    acc_ref[...] += jnp.dot(adj, z_ref[...], preferred_element_type=jnp.float32)

    @pl.when(k == pl.num_programs(1) - 1)
    def _():
        out_ref[...] = (acc_ref[...] + b_ref[...]).astype(out_ref.dtype)


# ---------------------------------------------------------------------------
# pallas_call wrappers
# ---------------------------------------------------------------------------
def _fused_layer1(adj_i8, feats, w1, b1, w2, *, apply_w1, tm, tk, vmem_limit):
    n_dst, n_src = adj_i8.shape
    fi = feats.shape[1]
    h = b1.shape[1]
    c = w2.shape[1]
    grid = (n_dst // tm, n_src // tk)

    in_specs = [
        pl.BlockSpec((tm, tk), lambda i, k: (i, k)),    # adj: streamed over K
        pl.BlockSpec((tk, fi), lambda i, k: (k, 0)),    # source features: K-tiled
    ]
    args = [adj_i8, feats]
    if apply_w1:
        in_specs.append(pl.BlockSpec((fi, h), lambda i, k: (0, 0)))  # w1 resident
        args.append(w1)
    in_specs.append(pl.BlockSpec((1, h), lambda i, k: (0, 0)))       # b1 resident
    in_specs.append(pl.BlockSpec((h, c), lambda i, k: (0, 0)))       # w2 resident
    args.extend([b1, w2])
    # NOTE: resident operands are tiny (<=2*F_p*H_p bf16); leaving the default
    # double-buffering costs little VMEM, so pipeline_mode tweaks are skipped.

    kernel = functools.partial(_layer1_fused_kernel, apply_w1=apply_w1)
    return pl.pallas_call(
        kernel,
        out_shape=jax.ShapeDtypeStruct((n_dst, c), jnp.bfloat16),
        grid=grid,
        in_specs=in_specs,
        out_specs=pl.BlockSpec((tm, c), lambda i, k: (i, 0)),
        scratch_shapes=[pltpu.VMEM((tm, fi), jnp.float32)],
        compiler_params=pltpu.CompilerParams(
            dimension_semantics=("parallel", "arbitrary"),
            vmem_limit_bytes=vmem_limit,
        ),
    )(*args)


def _agg_layer2(adj_i8, z, b2, *, tm, tk, vmem_limit):
    n_dst, n_src = adj_i8.shape
    c = z.shape[1]
    grid = (n_dst // tm, n_src // tk)
    return pl.pallas_call(
        _layer2_agg_kernel,
        out_shape=jax.ShapeDtypeStruct((n_dst, c), jnp.float32),
        grid=grid,
        in_specs=[
            pl.BlockSpec((tm, tk), lambda i, k: (i, k)),   # adj: streamed over K
            pl.BlockSpec((tk, c), lambda i, k: (k, 0)),    # z: K-tiled
            pl.BlockSpec((1, c), lambda i, k: (0, 0)),     # b2 resident
        ],
        out_specs=pl.BlockSpec((tm, c), lambda i, k: (i, 0)),
        scratch_shapes=[pltpu.VMEM((tm, c), jnp.float32)],
        compiler_params=pltpu.CompilerParams(
            dimension_semantics=("parallel", "arbitrary"),
            vmem_limit_bytes=vmem_limit,
        ),
    )(adj_i8, z, b2)


# ---------------------------------------------------------------------------
# Forward pass
# ---------------------------------------------------------------------------
def gcn_forward(adj_t, x, w1, b1, w2, b2, *, row_tile=256, col_tile=512):
    """adj_t: [N,N] (adj_t[dst,src]=1), x: [N,F], w1:[F,H], b1:[1,H], w2:[H,C], b2:[1,C]."""
    N = adj_t.shape[0]
    F = x.shape[1]
    H = w1.shape[1]
    C = w2.shape[1]

    # Lane-dense feature padding (128 lanes per vreg).
    F_p = _round_up(F, 128)
    H_p = _round_up(H, 128)
    C_p = _round_up(C, 128)
    n_128 = _round_up(N, 128)

    budget = _vmem_budget_bytes()

    # Heuristic on *padded* dims: if H_p < F_p, hoist the row-independent
    # projection x @ w1 out of the kernel (single XLA matmul) and aggregate
    # projected features; otherwise aggregate raw x and apply w1 in-epilogue.
    apply_w1 = not (H_p < F_p)
    fi = F_p if apply_w1 else H_p

    tm, tk = _choose_tiles(n_128, fi, H_p, C_p, budget, row_tile, col_tile)
    # Node padding so both grid axes divide evenly (zero padding keeps results exact).
    N_p = _round_up(n_128, math.lcm(tm, tk))

    # 0/1 adjacency stored as int8 (halves HBM bytes); cast to bf16 in-kernel.
    adj_p = _pad2d(adj_t, N_p, N_p, jnp.int8)
    w1_p = _pad2d(w1, F_p, H_p, jnp.bfloat16)
    b1_p = _pad2d(b1, 1, H_p, jnp.float32)
    w2_p = _pad2d(w2, H_p, C_p, jnp.bfloat16)
    b2_p = _pad2d(b2, 1, C_p, jnp.float32)

    if apply_w1:
        feats = _pad2d(x, N_p, F_p, jnp.bfloat16)
    else:
        x_p = _pad2d(x, N_p, F_p, jnp.bfloat16)
        feats = jnp.dot(x_p, w1_p,
                        preferred_element_type=jnp.float32).astype(jnp.bfloat16)

    # Layer 1 (fused): z = relu(aggregate(x) @ w1 + b1) @ w2, bf16 output.
    z_p = _fused_layer1(adj_p, feats, w1_p, b1_p, w2_p,
                        apply_w1=apply_w1, tm=tm, tk=tk, vmem_limit=budget)
    # Layer 2: pure aggregation out = adj @ z + b2, f32 output.
    out_p = _agg_layer2(adj_p, z_p, b2_p, tm=tm, tk=tk, vmem_limit=budget)

    return out_p[:N, :C]


def build_ring_adj_t(n):
    """Ring graph with self loops: edges (i -> (i+1) % n) plus (i -> i).
    adj_t[dst, src] = 1.0 so that adj_t @ X sums incoming-source features."""
    adj_t = jnp.zeros((n, n), dtype=jnp.float32)
    src = jnp.arange(n)
    dst = (src + 1) % n
    adj_t = adj_t.at[dst, src].set(1.0)
    adj_t = adj_t.at[src, src].set(1.0)
    return adj_t


def _ref_forward(adj_t, x, w1, b1, w2, b2):
    """Pure-JAX reference mirroring the kernel's bf16-operand / f32-accum path."""
    bf = lambda a: a.astype(jnp.bfloat16)
    dot = lambda a, b: jnp.dot(bf(a), bf(b), preferred_element_type=jnp.float32)
    F_p = _round_up(x.shape[1], 128)
    H_p = _round_up(w1.shape[1], 128)
    if H_p < F_p:
        feats = dot(x, w1)
        h1 = jnp.maximum(dot(adj_t, feats) + b1, 0.0)
    else:
        agg = dot(adj_t, x)
        h1 = jnp.maximum(dot(agg, w1) + b1, 0.0)
    z = bf(dot(h1, w2))
    return dot(adj_t, z) + b2


if __name__ == "__main__":
    # Small shapes consistent with GCN(in_feats, hidden_size, num_classes).
    N = 8
    IN_FEATS = 16
    HIDDEN = 32
    NUM_CLASSES = 8

    key = jax.random.PRNGKey(0)
    kx, kw1, kb1, kw2, kb2 = jax.random.split(key, 5)

    x = jax.random.normal(kx, (N, IN_FEATS), dtype=jnp.float32)
    w1 = jax.random.normal(kw1, (IN_FEATS, HIDDEN), dtype=jnp.float32) * 0.1
    b1 = jax.random.normal(kb1, (1, HIDDEN), dtype=jnp.float32) * 0.1
    w2 = jax.random.normal(kw2, (HIDDEN, NUM_CLASSES), dtype=jnp.float32) * 0.1
    b2 = jax.random.normal(kb2, (1, NUM_CLASSES), dtype=jnp.float32) * 0.1

    adj_t = build_ring_adj_t(N)

    out = gcn_forward(adj_t, x, w1, b1, w2, b2)
    out = jax.block_until_ready(out)

    ref = _ref_forward(adj_t, x, w1, b1, w2, b2)
    assert out.shape == (N, NUM_CLASSES)
    err = float(jnp.max(jnp.abs(out - ref)))
    assert jnp.allclose(out, ref, atol=5e-3, rtol=5e-3), "max abs err %f" % err

    print("KERNEL_OK")
</pallas_src>

<mosaic_0001>
module attributes {stable_mosaic.version = 11 : i64} {
  func.func @_layer1_fused_kernel(%arg0: i32, %arg1: i32, %arg2: memref<128x128xi8, #tpu.memory_space<vmem>>, %arg3: memref<128x128xbf16, #tpu.memory_space<vmem>>, %arg4: memref<128x128xbf16, #tpu.memory_space<vmem>>, %arg5: memref<1x128xf32, #tpu.memory_space<vmem>>, %arg6: memref<128x128xbf16, #tpu.memory_space<vmem>>, %arg7: memref<128x128xbf16, #tpu.memory_space<vmem>>, %arg8: memref<128x128xf32, #tpu.memory_space<vmem>>) attributes {dimension_semantics = [#tpu.dimension_semantics<parallel>, #tpu.dimension_semantics<arbitrary>], iteration_bounds = array<i64: 1, 1>, scalar_prefetch = 0 : i64, scratch_operands = 1 : i64, tpu.core_type = #tpu.core_type<tc>, window_params = [{transform_indices = @transform_0, window_bounds = array<i64: 128, 128>}, {transform_indices = @transform_1, window_bounds = array<i64: 128, 128>}, {pipeline_mode = #tpu.pipeline_mode<synchronous>, transform_indices = @transform_2, window_bounds = array<i64: 128, 128>}, {pipeline_mode = #tpu.pipeline_mode<synchronous>, transform_indices = @transform_3, window_bounds = array<i64: 1, 128>}, {pipeline_mode = #tpu.pipeline_mode<synchronous>, transform_indices = @transform_4, window_bounds = array<i64: 128, 128>}, {transform_indices = @transform_5, window_bounds = array<i64: 128, 128>}]} {
    %c0_i32 = arith.constant 0 : i32
    %0 = arith.cmpi eq, %arg1, %c0_i32 : i32
    %1 = arith.extui %0 : i1 to i32
    %c0_i32_0 = arith.constant 0 : i32
    %2 = arith.cmpi ne, %1, %c0_i32_0 : i32
    scf.if %2 {
      %cst_10 = arith.constant 0.000000e+00 : f32
      %13 = vector.broadcast %cst_10 : f32 to vector<128x128xf32>
      %c0_11 = arith.constant 0 : index
      %c0_12 = arith.constant 0 : index
      %14 = vector.load %arg8[%c0_11, %c0_12] : memref<128x128xf32, #tpu.memory_space<vmem>>, vector<128x128xf32>
      tpu.vector_store %arg8[%c0_11, %c0_12], %13 {strides = array<i32>} : memref<128x128xf32, #tpu.memory_space<vmem>>, vector<128x128xf32>,
    } else {
    }
    %c0 = arith.constant 0 : index
    %c0_1 = arith.constant 0 : index
    %3 = vector.load %arg2[%c0, %c0_1] : memref<128x128xi8, #tpu.memory_space<vmem>>, vector<128x128xi8>
    %4 = arith.sitofp %3 : vector<128x128xi8> to vector<128x128xbf16>
    %c0_2 = arith.constant 0 : index
    %c0_3 = arith.constant 0 : index
    %5 = vector.load %arg8[%c0_2, %c0_3] : memref<128x128xf32, #tpu.memory_space<vmem>>, vector<128x128xf32>
    %c0_4 = arith.constant 0 : index
    %c0_5 = arith.constant 0 : index
    %6 = vector.load %arg3[%c0_4, %c0_5] : memref<128x128xbf16, #tpu.memory_space<vmem>>, vector<128x128xbf16>
    %cst = arith.constant dense<0.000000e+00> : vector<128x128xf32>
    %7 = tpu.matmul %4, %6, %cst {dimension_numbers = #tpu.dot_dimension_numbers<[1], [0], [0], [1], [0, 0, 1, 1], [], []>} : vector<128x128xbf16>, vector<128x128xbf16>, vector<128x128xf32> -> vector<128x128xf32>
    %8 = arith.addf %5, %7 : vector<128x128xf32>
    %c0_6 = arith.constant 0 : index
    %c0_7 = arith.constant 0 : index
    %9 = vector.load %arg8[%c0_6, %c0_7] : memref<128x128xf32, #tpu.memory_space<vmem>>, vector<128x128xf32>
    tpu.vector_store %arg8[%c0_6, %c0_7], %8 {strides = array<i32>} : memref<128x128xf32, #tpu.memory_space<vmem>>, vector<128x128xf32>,
    %c0_i32_8 = arith.constant 0 : i32
    %10 = arith.cmpi eq, %arg1, %c0_i32_8 : i32
    %11 = arith.extui %10 : i1 to i32
    %c0_i32_9 = arith.constant 0 : i32
    %12 = arith.cmpi ne, %11, %c0_i32_9 : i32
    scf.if %12 {
      %c0_10 = arith.constant 0 : index
      %c0_11 = arith.constant 0 : index
      %13 = vector.load %arg8[%c0_10, %c0_11] : memref<128x128xf32, #tpu.memory_space<vmem>>, vector<128x128xf32>
      %14 = arith.truncf %13 : vector<128x128xf32> to vector<128x128xbf16>
      %c0_12 = arith.constant 0 : index
      %c0_13 = arith.constant 0 : index
      %15 = vector.load %arg4[%c0_12, %c0_13] : memref<128x128xbf16, #tpu.memory_space<vmem>>, vector<128x128xbf16>
      %cst_14 = arith.constant dense<0.000000e+00> : vector<128x128xf32>
      %16 = tpu.matmul %14, %15, %cst_14 {dimension_numbers = #tpu.dot_dimension_numbers<[1], [0], [0], [1], [0, 0, 1, 1], [], []>} : vector<128x128xbf16>, vector<128x128xbf16>, vector<128x128xf32> -> vector<128x128xf32>
      %c0_15 = arith.constant 0 : index
      %c0_16 = arith.constant 0 : index
      %17 = vector.load %arg5[%c0_15, %c0_16] : memref<1x128xf32, #tpu.memory_space<vmem>>, vector<1x128xf32>
      %18 = vector.broadcast %17 : vector<1x128xf32> to vector<128x128xf32>
      %19 = arith.addf %16, %18 : vector<128x128xf32>
      %cst_17 = arith.constant 0.000000e+00 : f32
      %20 = vector.broadcast %cst_17 : f32 to vector<128x128xf32>
      %21 = arith.maximumf %19, %20 : vector<128x128xf32>
      %22 = arith.truncf %21 : vector<128x128xf32> to vector<128x128xbf16>
      %c0_18 = arith.constant 0 : index
      %c0_19 = arith.constant 0 : index
      %23 = vector.load %arg6[%c0_18, %c0_19] : memref<128x128xbf16, #tpu.memory_space<vmem>>, vector<128x128xbf16>
      %cst_20 = arith.constant dense<0.000000e+00> : vector<128x128xf32>
      %24 = tpu.matmul %22, %23, %cst_20 {dimension_numbers = #tpu.dot_dimension_numbers<[1], [0], [0], [1], [0, 0, 1, 1], [], []>} : vector<128x128xbf16>, vector<128x128xbf16>, vector<128x128xf32> -> vector<128x128xf32>
      %25 = arith.truncf %24 : vector<128x128xf32> to vector<128x128xbf16>
      %c0_21 = arith.constant 0 : index
      %c0_22 = arith.constant 0 : index
      %26 = vector.load %arg7[%c0_21, %c0_22] : memref<128x128xbf16, #tpu.memory_space<vmem>>, vector<128x128xbf16>
      tpu.vector_store %arg7[%c0_21, %c0_22], %25 {strides = array<i32>} : memref<128x128xbf16, #tpu.memory_space<vmem>>, vector<128x128xbf16>,
    } else {
    }
    return
  }
  func.func @transform_0(%arg0: i32, %arg1: i32) -> (i32, i32) {
    %c0_i32 = arith.constant 0 : i32
    return %arg0, %arg1 : i32, i32
  }
  func.func @transform_1(%arg0: i32, %arg1: i32) -> (i32, i32) {
    %c0_i32 = arith.constant 0 : i32
    %c0_i32_0 = arith.constant 0 : i32
    return %arg1, %c0_i32 : i32, i32
  }
  func.func @transform_2(%arg0: i32, %arg1: i32) -> (i32, i32) {
    %c0_i32 = arith.constant 0 : i32
    %c0_i32_0 = arith.constant 0 : i32
    %c0_i32_1 = arith.constant 0 : i32
    return %c0_i32, %c0_i32_0 : i32, i32
  }
  func.func @transform_3(%arg0: i32, %arg1: i32) -> (i32, i32) {
    %c0_i32 = arith.constant 0 : i32
    %c0_i32_0 = arith.constant 0 : i32
    %c0_i32_1 = arith.constant 0 : i32
    return %c0_i32, %c0_i32_0 : i32, i32
  }
  func.func @transform_4(%arg0: i32, %arg1: i32) -> (i32, i32) {
    %c0_i32 = arith.constant 0 : i32
    %c0_i32_0 = arith.constant 0 : i32
    %c0_i32_1 = arith.constant 0 : i32
    return %c0_i32, %c0_i32_0 : i32, i32
  }
  func.func @transform_5(%arg0: i32, %arg1: i32) -> (i32, i32) {
    %c0_i32 = arith.constant 0 : i32
    %c0_i32_0 = arith.constant 0 : i32
    return %arg0, %c0_i32 : i32, i32
  }
}

</mosaic_0001>

<bundles_post_ra>
// kernel: tpu_custom_call.1
= control target key start
LH: loop header
LB: loop body
LE: loop exit
PB: predicated region body
PF: predicated region fallthrough
CT: control target
= control target key end

     0   :  { %10 = vsyncpa [#allocation4], 0  ;;  %s1333_s0 = inlined_call_operand.hbm [shape: s8[128,128], index: 0, kind: input, shape index: {}]   ;;  %s1334_s1 = inlined_call_operand.hbm [shape: bf16[128,128], index: 1, kind: input, shape index: {}]   ;;  %s1335_s2 = inlined_call_operand.hbm [shape: bf16[128,128], index: 2, kind: input, shape index: {}]   ;;  %s1336_s3 = inlined_call_operand.vmem [shape: f32[1,128], index: 3, kind: input, shape index: {}]   ;;  %s1337_s4 = inlined_call_operand.hbm [shape: bf16[128,128], index: 4, kind: input, shape index: {}]   ;;  %s1338_s5 = inlined_call_operand.hbm [shape: bf16[128,128], index: 5, kind: output, shape index: {}]  }
   0x1   :  { %11 = vsyncpa [#allocation7], 0 }
   0x2   :  { %12 = vsyncpa [#allocation10], 0 }
   0x3   :  { %13 = vsyncpa [#allocation5], 0  ;;  %s1212_s18 = smov [#allocation6]   ;;  %s1094_s22 = scalar_lea.hbm %s1334_s1, 1024 }
   0x4   :  { %s31_s19 = sshll.u32 %s1212_s18, 4  ;;  %p1095_p0 = scmp.ne.s32.totalorder %s1334_s1, %s1094_s22  ;;  %s32_s19 = int_to_ptr.vmem [resolvable:$true] %s31_s19 }
   0x5   :  { %p1098_p1 = scmp.lt.u32.totalorder %s1094_s22, %s1334_s1 }
   0x7   :  { %p1100_p2 = pnand %p1098_p1, %p1095_p0 }
   0x9   :  { %1103 = shalt.err (!%p1100_p2)
}
   0xa   :  { %s1104_s27 = scalar_lea.vmem %s32_s19, 1024  ;;  %p1109_p4 = scmp.lt.s32.totalorder %s32_s19, %s32_s19 }
   0xb   :  { %p1105_p3 = scmp.ne.s32.totalorder %s32_s19, %s1104_s27  ;;  %p1110_p5 = scmp.lt.s32.totalorder %s1104_s27, %s1104_s27 }
   0xd   :  { %p1111_p6 = por %p1110_p5, %p1109_p4 }
   0xf   :  { %p1112_p7 = pnand %p1111_p6, %p1105_p3 }
  0x11   :  { %1115 = shalt.err (!%p1112_p7)
}
  0x12   :  { %s1213_s28 = smov 64   ;;  %s1214_s29 = smov 4  }
  0x13   :  { %37 = dma.hbm_to_vmem [thread:$0]  %s1334_s1, 1024, %s32_s19, [#allocation7], %s1213_s28, %s1213_s28, %s1214_s29  }
  0x14   :  { %s1215_s7 = smov [#allocation3]   ;;  %s1116_s11 = scalar_lea.hbm %s1333_s0, 512 }
  0x15   :  { %s19_s8 = sshll.u32 %s1215_s7, 4  ;;  %p1117_p8 = scmp.ne.s32.totalorder %s1333_s0, %s1116_s11  ;;  %s20_s8 = int_to_ptr.vmem [resolvable:$true] %s19_s8 }
  0x16   :  { %p1120_p9 = scmp.lt.u32.totalorder %s1116_s11, %s1333_s0 }
  0x18   :  { %p1122_p10 = pnand %p1120_p9, %p1117_p8 }
  0x1a   :  { %1125 = shalt.err (!%p1122_p10)
}
  0x1b   :  { %s1126_s16 = scalar_lea.vmem %s20_s8, 512  ;;  %p1131_p12 = scmp.lt.s32.totalorder %s20_s8, %s20_s8 }
  0x1c   :  { %p1127_p11 = scmp.ne.s32.totalorder %s20_s8, %s1126_s16  ;;  %p1132_p13 = scmp.lt.s32.totalorder %s1126_s16, %s1126_s16 }
  0x1e   :  { %p1133_p0 = por %p1132_p13, %p1131_p12 }
  0x20   :  { %p1134_p1 = pnand %p1133_p0, %p1127_p11 }
  0x22   :  { %1137 = shalt.err (!%p1134_p1)
}
  0x23   :  { %s1216_s1 = smov 128   ;;  %s1217_s17 = smov 8  }
  0x24   :  { %25 = dma.hbm_to_vmem [thread:$0]  %s1333_s0, 512, %s20_s8, [#allocation4], %s1216_s1, %s1216_s1, %s1217_s17  }
  0x25   :  { %s1218_s20 = smov [#allocation8]   ;;  %s1219_s22 = smov [#allocation9]  }
  0x26   :  { %s43_s21 = sshll.u32 %s1218_s20, 4  ;;  %s57_s23 = sshll.u32 %s1219_s22, 4  ;;  %s44_s21 = int_to_ptr.vmem [resolvable:$true] %s43_s21  ;;  %s1278_s23 = int_to_ptr.vmem [resolvable:$true] %s57_s23 }
  0x27   :  { %s1138_s26 = scalar_lea.hbm %s1335_s2, 1024 }
  0x28   :  { %p1139_p2 = scmp.ne.s32.totalorder %s1335_s2, %s1138_s26  ;;  %p1142_p3 = scmp.lt.u32.totalorder %s1138_s26, %s1335_s2 }
  0x2a   :  { %p1144_p4 = pnand %p1142_p3, %p1139_p2 }
  0x2c   :  { %1147 = shalt.err (!%p1144_p4)
}
  0x2d   :  { %s1148_s0 = scalar_lea.vmem %s44_s21, 1024  ;;  %p1153_p6 = scmp.lt.s32.totalorder %s44_s21, %s44_s21 }
  0x2e   :  { %p1149_p5 = scmp.ne.s32.totalorder %s44_s21, %s1148_s0  ;;  %p1154_p7 = scmp.lt.s32.totalorder %s1148_s0, %s1148_s0 }
  0x30   :  { %p1155_p8 = por %p1154_p7, %p1153_p6 }
  0x32   :  { %p1156_p9 = pnand %p1155_p8, %p1149_p5 }
  0x34   :  { %1159 = shalt.err (!%p1156_p9)
}
  0x35   :  { %49 = dma.hbm_to_vmem [thread:$0]  %s1335_s2, 1024, %s44_s21, [#allocation7], %s1213_s28, %s1213_s28, %s1214_s29  }
  0x36   :  { %s1160_s12 = scalar_lea.hbm %s1337_s4, 1024 }
  0x37   :  { %p1161_p10 = scmp.ne.s32.totalorder %s1337_s4, %s1160_s12  ;;  %p1164_p11 = scmp.lt.u32.totalorder %s1160_s12, %s1337_s4 }
  0x39   :  { %p1166_p12 = pnand %p1164_p11, %p1161_p10 }
  0x3b   :  { %1169 = shalt.err (!%p1166_p12)
}
  0x3c   :  { %s1170_s1 = scalar_lea.vmem %s1278_s23, 1024  ;;  %p1175_p0 = scmp.lt.s32.totalorder %s1278_s23, %s1278_s23 }
  0x3d   :  { %p1171_p13 = scmp.ne.s32.totalorder %s1278_s23, %s1170_s1  ;;  %p1176_p1 = scmp.lt.s32.totalorder %s1170_s1, %s1170_s1 }
  0x3f   :  { %p1177_p2 = por %p1176_p1, %p1175_p0 }
  0x41   :  { %p1178_p3 = pnand %p1177_p2, %p1171_p13 }
  0x43   :  { %1181 = shalt.err (!%p1178_p3)
}
  0x44   :  { %63 = dma.hbm_to_vmem [thread:$0]  %s1337_s4, 1024, %s1278_s23, [#allocation10], %s1213_s28, %s1213_s28, %s1214_s29  }
  0x45   :  { %1204 = dma.done.wait [#allocation4], 512  }
  0x46   :  { %1205 = vsyncadd [#allocation4], 4294966784 }
  0x47   :  { %1206 = dma.done.wait [#allocation7], 2048  }
  0x48   :  { %1207 = vsyncadd [#allocation7], 4294965248 }
  0x49   :  { %1208 = dma.done.wait [#allocation10], 1024  }
  0x4a   :  { %1209 = vsyncadd [#allocation10], 4294966272  ;;  %v1070_v0 = vld [vmem:[#allocation6] sm:$0xff]   ;;  %v1071_v1 = vld [vmem:[#allocation6 + $0x8] sm:$0xff]  }
  0x4b   :  { %949 = vmatprep.subr.bf16.mxu0 %v1070_v0  ;;  %v1072_v2 = vld [vmem:[#allocation6 + $0x10] sm:$0xff]   ;;  %v1073_v3 = vld [vmem:[#allocation6 + $0x18] sm:$0xff]   ;;  %v97_v4 = vld [vmem:[#allocation3] sm:$0xff] }
  0x4c   :  { %950 = vmatpush3.bf16.msra.mxu0 %v1070_v0  ;;  %v101_v5 = vunpack.c.l.s8.bf16 %v97_v4  ;;  %v1078_v6 = vld [vmem:[#allocation8] sm:$0xff]   ;;  %v1079_v7 = vld [vmem:[#allocation8 + $0x8] sm:$0xff]   ;;  %v1080_v9 = vld [vmem:[#allocation8 + $0x10] sm:$0xff]   ;;  %v102_v17 = vunpack.c.h.s8.bf16 %v97_v4 }
  0x4d   :  { %951 = vmatprep.subr.bf16.mxu0 %v1071_v1  ;;  %v1074_v8 = vld [vmem:[#allocation6 + $0x20] sm:$0xff]   ;;  %981 = vmatprep.subr.bf16.mxu1 %v1078_v6  ;;  %v1075_v10 = vld [vmem:[#allocation6 + $0x28] sm:$0xff]   ;;  %v1081_v11 = vld [vmem:[#allocation8 + $0x18] sm:$0xff]  }
  0x4e   :  { %965 = vmatprep.mubr.bf16.mxu0 %v101_v5  ;;  %982 = vmatpush3.bf16.msra.mxu1 %v1078_v6  ;;  %v1076_v12 = vld [vmem:[#allocation6 + $0x30] sm:$0xff]   ;;  %v1082_v13 = vld [vmem:[#allocation8 + $0x20] sm:$0xff]   ;;  %v1077_v14 = vld [vmem:[#allocation6 + $0x38] sm:$0xff]  }
  0x4f   :  { %983 = vmatprep.subr.bf16.mxu1 %v1079_v7  ;;  %v1083_v15 = vld [vmem:[#allocation8 + $0x28] sm:$0xff]   ;;  %v1084_v18 = vld [vmem:[#allocation8 + $0x30] sm:$0xff]   ;;  %v100_v23 = vld [vmem:[#allocation3 + $0x18] sm:$0xff] }
  0x50   :  { %952 = vmatpush3.bf16.msra.mxu0 %v1071_v1  ;;  %v98_v16 = vld [vmem:[#allocation3 + $0x8] sm:$0xff]  ;;  %v99_v20 = vld [vmem:[#allocation3 + $0x10] sm:$0xff]  ;;  %v107_v25 = vunpack.c.l.s8.bf16 %v100_v23  ;;  %v108_v26 = vunpack.c.h.s8.bf16 %v100_v23  ;;  %v1085_v27 = vld [vmem:[#allocation8 + $0x38] sm:$0xff]  }
  0x51   :  { %953 = vmatprep.subr.bf16.mxu0 %v1072_v2  ;;  %v103_v19 = vunpack.c.l.s8.bf16 %v98_v16  ;;  %v104_v21 = vunpack.c.h.s8.bf16 %v98_v16  ;;  %v105_v22 = vunpack.c.l.s8.bf16 %v99_v20  ;;  %v106_v24 = vunpack.c.h.s8.bf16 %v99_v20  ;;  %v1086_v28 = vld [vmem:[#allocation9] sm:$0xff]   ;;  %v1087_v29 = vld [vmem:[#allocation9 + $0x8] sm:$0xff]   ;;  %v1088_v30 = vld [vmem:[#allocation9 + $0x10] sm:$0xff]  }
  0x52   :  { %984 = vmatpush3.bf16.msra.mxu1 %v1079_v7  ;;  %v1089_v31 = vld [vmem:[#allocation9 + $0x18] sm:$0xff]   ;;  %v1090_v32 = vld [vmem:[#allocation9 + $0x20] sm:$0xff]   ;;  %v1091_v33 = vld [vmem:[#allocation9 + $0x28] sm:$0xff]  }
  0x53   :  { %985 = vmatprep.subr.bf16.mxu1 %v1080_v9  ;;  %v1092_v58 = vld [vmem:[#allocation9 + $0x30] sm:$0xff]   ;;  %v1093_v59 = vld [vmem:[#allocation9 + $0x38] sm:$0xff]   ;;  %v805_v60 = vld [vmem:[%s1336_s3] ss:$0 sm:$0xff]  ;;  %s1220_s3 = smov [#allocation11]  }
  0x54   :  { %954 = vmatpush3.bf16.msra.mxu0 %v1072_v2  ;;  %s783_s19 = sshll.u32 %s1220_s3, 4  ;;  %s784_s19 = int_to_ptr.vmem [resolvable:$true] %s783_s19 }
  0x55   :  { %955 = vmatprep.subr.bf16.mxu0 %v1073_v3  ;;  %s1182_s20 = scalar_lea.vmem %s784_s19, 1024  ;;  %p1187_p5 = scmp.lt.s32.totalorder %s784_s19, %s784_s19 }
  0x56   :  { %986 = vmatpush3.bf16.msra.mxu1 %v1080_v9  ;;  %p1183_p4 = scmp.ne.s32.totalorder %s784_s19, %s1182_s20  ;;  %p1188_p6 = scmp.lt.s32.totalorder %s1182_s20, %s1182_s20 }
  0x57   :  { %987 = vmatprep.subr.bf16.mxu1 %v1081_v11 }
  0x58   :  { %956 = vmatpush3.bf16.msra.mxu0 %v1073_v3  ;;  %p1189_p7 = por %p1188_p6, %p1187_p5 }
  0x59   :  { %957 = vmatprep.subr.bf16.mxu0 %v1074_v8 }
  0x5a   :  { %988 = vmatpush3.bf16.msra.mxu1 %v1081_v11  ;;  %p1190_p8 = pnand %p1189_p7, %p1183_p4 }
  0x5b   :  { %989 = vmatprep.subr.bf16.mxu1 %v1082_v13 }
  0x5c   :  { %958 = vmatpush3.bf16.msra.mxu0 %v1074_v8 }
  0x5d   :  { %959 = vmatprep.subr.bf16.mxu0 %v1075_v10 }
  0x5e   :  { %990 = vmatpush3.bf16.msra.mxu1 %v1082_v13 }
  0x5f   :  { %991 = vmatprep.subr.bf16.mxu1 %v1083_v15 }
  0x60   :  { %960 = vmatpush3.bf16.msra.mxu0 %v1075_v10 }
  0x61   :  { %961 = vmatprep.subr.bf16.mxu0 %v1076_v12 }
  0x62   :  { %992 = vmatpush3.bf16.msra.mxu1 %v1083_v15 }
  0x63   :  { %993 = vmatprep.subr.bf16.mxu1 %v1084_v18 }
  0x64   :  { %962 = vmatpush3.bf16.msra.mxu0 %v1076_v12 }
  0x65   :  { %963 = vmatprep.subr.bf16.mxu0 %v1077_v14 }
  0x66   :  { %994 = vmatpush3.bf16.msra.mxu1 %v1084_v18 }
  0x67   :  { %995 = vmatprep.subr.bf16.mxu1 %v1085_v27 }
  0x68   :  { %964 = vmatpush3.bf16.msra.mxu0 %v1077_v14 }
  0x69   :  { %1013 = vmatprep.subr.bf16.mxu0 %v1086_v28 }
  0x6a   :  { %996 = vmatpush3.bf16.msra.mxu1 %v1085_v27 }
  0x6b   :  { %966 = vmatmul.mubr.bf16.vlgmr.msra.gmra.mrb[0].mxu0 %v102_v17  ;;  %1045 = vmatprep.subr.bf16.mxu1 %v1086_v28 }
  0x6c   :  { %969 = vmatprep.mubr.bf16.mxu0 %v103_v19  ;;  %1014 = vmatpush3.bf16.msra.mxu0 %v1086_v28 }
  0x6d   :  { %1015 = vmatprep.subr.bf16.mxu0 %v1087_v29 }
  0x70   :  { %1016 = vmatpush3.bf16.msra.mxu0 %v1087_v29 }
  0x71   :  { %1017 = vmatprep.subr.bf16.mxu0 %v1088_v30 }
  0x73   :  { %970 = vmatmul.mubr.bf16.gmra.mrb[4].mxu0 %v104_v21 }
  0x74   :  { %973 = vmatprep.mubr.bf16.mxu0 %v105_v22  ;;  %1018 = vmatpush3.bf16.msra.mxu0 %v1088_v30 }
  0x75   :  { %1019 = vmatprep.subr.bf16.mxu0 %v1089_v31 }
  0x78   :  { %1020 = vmatpush3.bf16.msra.mxu0 %v1089_v31 }
  0x79   :  { %1021 = vmatprep.subr.bf16.mxu0 %v1090_v32 }
  0x7b   :  { %974 = vmatmul.mubr.bf16.gmra.mrb[8].mxu0 %v106_v24 }
  0x7c   :  { %977 = vmatprep.mubr.bf16.mxu0 %v107_v25  ;;  %1022 = vmatpush3.bf16.msra.mxu0 %v1090_v32 }
  0x7d   :  { %1023 = vmatprep.subr.bf16.mxu0 %v1091_v33 }
  0x80   :  { %1024 = vmatpush3.bf16.msra.mxu0 %v1091_v33 }
  0x81   :  { %1025 = vmatprep.subr.bf16.mxu0 %v1092_v58 }
  0x83   :  { %978 = vmatmul.mubr.bf16.gmra.mrb[12].mxu0 %v108_v26 }
  0x84   :  { %1026 = vmatpush3.bf16.msra.mxu0 %v1092_v58 }
  0x85   :  { %1027 = vmatprep.subr.bf16.mxu0 %v1093_v59 }
  0x88   :  { %1028 = vmatpush3.bf16.msra.mxu0 %v1093_v59 }
 0x13e   :  { %v967_v34 = vpop.f32.mrb[0].mxu0 }
 0x13f   :  { %v223_v35 = vpop.f32.mrb[1].mxu0 }
 0x140   :  { %v968_v36 = vpop.f32.mrb[2].mxu0 }
 0x141   :  { %v338_v37 = vpack.c.bf16 %v968_v36, %v967_v34  ;;  %v226_v38 = vpop.f32.mrb[3].mxu0 }
 0x142   :  { %v337_v39 = vpack.c.bf16 %v226_v38, %v223_v35 }
 0x144   :  { %997 = vmatprep.mubr.bf16.mxu1 %v337_v39 }
 0x145   :  { %998 = vmatmul.mubr.bf16.vlgmr.msra.gmra.mrb[0].mxu1 %v338_v37 }
 0x146   :  { %v971_v40 = vpop.f32.mrb[4].mxu0  ;;  %1053 = vmatpush3.bf16.msra.mxu1 %v1086_v28 }
 0x147   :  { %v239_v41 = vpop.f32.mrb[5].mxu0  ;;  %1046 = vmatprep.subr.bf16.mxu1 %v1087_v29 }
 0x148   :  { %v972_v42 = vpop.f32.mrb[6].mxu0 }
 0x149   :  { %v340_v43 = vpack.c.bf16 %v972_v42, %v971_v40  ;;  %v242_v44 = vpop.f32.mrb[7].mxu0 }
 0x14a   :  { %v339_v45 = vpack.c.bf16 %v242_v44, %v239_v41  ;;  %1054 = vmatpush3.bf16.msra.mxu1 %v1087_v29 }
 0x14b   :  { %1047 = vmatprep.subr.bf16.mxu1 %v1088_v30 }
 0x14c   :  { %1001 = vmatprep.mubr.bf16.mxu1 %v339_v45 }
 0x14d   :  { %1002 = vmatmul.mubr.bf16.gmra.mrb[4].mxu1 %v340_v43 }
 0x14e   :  { %v975_v46 = vpop.f32.mrb[8].mxu0  ;;  %1055 = vmatpush3.bf16.msra.mxu1 %v1088_v30 }
 0x14f   :  { %v255_v47 = vpop.f32.mrb[9].mxu0  ;;  %1048 = vmatprep.subr.bf16.mxu1 %v1089_v31 }
 0x150   :  { %v976_v48 = vpop.f32.mrb[10].mxu0 }
 0x151   :  { %v342_v49 = vpack.c.bf16 %v976_v48, %v975_v46  ;;  %v258_v50 = vpop.f32.mrb[11].mxu0 }
 0x152   :  { %v341_v51 = vpack.c.bf16 %v258_v50, %v255_v47  ;;  %1056 = vmatpush3.bf16.msra.mxu1 %v1089_v31 }
 0x153   :  { %1049 = vmatprep.subr.bf16.mxu1 %v1090_v32 }
 0x154   :  { %1005 = vmatprep.mubr.bf16.mxu1 %v341_v51 }
 0x155   :  { %1006 = vmatmul.mubr.bf16.gmra.mrb[8].mxu1 %v342_v49 }
 0x156   :  { %v979_v52 = vpop.f32.mrb[12].mxu0  ;;  %1057 = vmatpush3.bf16.msra.mxu1 %v1090_v32 }
 0x157   :  { %v271_v53 = vpop.f32.mrb[13].mxu0  ;;  %1050 = vmatprep.subr.bf16.mxu1 %v1091_v33 }
 0x158   :  { %v980_v54 = vpop.f32.mrb[14].mxu0 }
 0x159   :  { %v344_v55 = vpack.c.bf16 %v980_v54, %v979_v52  ;;  %v274_v56 = vpop.f32.mrb[15].mxu0 }
 0x15a   :  { %v343_v57 = vpack.c.bf16 %v274_v56, %v271_v53  ;;  %1058 = vmatpush3.bf16.msra.mxu1 %v1091_v33 }
 0x15b   :  { %1051 = vmatprep.subr.bf16.mxu1 %v1092_v58 }
 0x15c   :  { %1009 = vmatprep.mubr.bf16.mxu1 %v343_v57 }
 0x15d   :  { %1010 = vmatmul.mubr.bf16.gmra.mrb[12].mxu1 %v344_v55 }
 0x15e   :  { %1059 = vmatpush3.bf16.msra.mxu1 %v1092_v58 }
 0x15f   :  { %1052 = vmatprep.subr.bf16.mxu1 %v1093_v59 }
 0x162   :  { %1060 = vmatpush3.bf16.msra.mxu1 %v1093_v59 }
 0x218   :  { %v999_v61 = vpop.f32.mrb[0].mxu1 }
 0x219   :  { %v459_v62 = vadd.f32 %v999_v61, %v805_v60  ;;  %v450_v63 = vpop.f32.mrb[1].mxu1 }
 0x21a   :  { %v451_v0 = vadd.f32 %v805_v60, %v450_v63  ;;  %v1000_v1 = vpop.f32.mrb[2].mxu1 }
 0x21b   :  { %v462_v2 = vadd.f32 %v1000_v1, %v805_v60  ;;  %v453_v3 = vpop.f32.mrb[3].mxu1  ;;  %v515_v5 = vmax.f32 %v459_v62, 0.0 }
 0x21c   :  { %v454_v4 = vadd.f32 %v805_v60, %v453_v3  ;;  %v513_v7 = vmax.f32 %v451_v0, 0.0 }
 0x21d   :  { %v516_v6 = vmax.f32 %v462_v2, 0.0 }
 0x21e   :  { %v514_v8 = vmax.f32 %v454_v4, 0.0 }
 0x21f   :  { %v530_v9 = vpack.c.bf16 %v516_v6, %v515_v5 }
 0x220   :  { %v529_v10 = vpack.c.bf16 %v514_v8, %v513_v7  ;;  %v1003_v11 = vpop.f32.mrb[4].mxu1 }
 0x221   :  { %v475_v12 = vadd.f32 %v1003_v11, %v805_v60  ;;  %v466_v13 = vpop.f32.mrb[5].mxu1 }
 0x222   :  { %v467_v14 = vadd.f32 %v805_v60, %v466_v13  ;;  %v1004_v15 = vpop.f32.mrb[6].mxu1  ;;  %1029 = vmatprep.mubr.bf16.mxu0 %v529_v10 }
 0x223   :  { %v478_v16 = vadd.f32 %v1004_v15, %v805_v60  ;;  %v469_v17 = vpop.f32.mrb[7].mxu1  ;;  %1030 = vmatmul.mubr.bf16.vlgmr.msra.gmra.mrb[16].mxu0 %v530_v9  ;;  %v519_v19 = vmax.f32 %v475_v12, 0.0 }
 0x224   :  { %v470_v18 = vadd.f32 %v805_v60, %v469_v17  ;;  %v517_v21 = vmax.f32 %v467_v14, 0.0 }
 0x225   :  { %v520_v20 = vmax.f32 %v478_v16, 0.0 }
 0x226   :  { %v518_v22 = vmax.f32 %v470_v18, 0.0 }
 0x227   :  { %v532_v23 = vpack.c.bf16 %v520_v20, %v519_v19 }
 0x228   :  { %v531_v24 = vpack.c.bf16 %v518_v22, %v517_v21  ;;  %v1007_v25 = vpop.f32.mrb[8].mxu1 }
 0x229   :  { %v491_v26 = vadd.f32 %v1007_v25, %v805_v60  ;;  %v482_v27 = vpop.f32.mrb[9].mxu1 }
 0x22a   :  { %v483_v28 = vadd.f32 %v805_v60, %v482_v27  ;;  %v1008_v29 = vpop.f32.mrb[10].mxu1  ;;  %1033 = vmatprep.mubr.bf16.mxu0 %v531_v24 }
 0x22b   :  { %v494_v30 = vadd.f32 %v1008_v29, %v805_v60  ;;  %v485_v31 = vpop.f32.mrb[11].mxu1  ;;  %1034 = vmatmul.mubr.bf16.gmra.mrb[20].mxu0 %v532_v23  ;;  %v523_v33 = vmax.f32 %v491_v26, 0.0 }
 0x22c   :  { %v486_v32 = vadd.f32 %v805_v60, %v485_v31  ;;  %v521_v35 = vmax.f32 %v483_v28, 0.0 }
 0x22d   :  { %v524_v34 = vmax.f32 %v494_v30, 0.0 }
 0x22e   :  { %v522_v36 = vmax.f32 %v486_v32, 0.0 }
 0x22f   :  { %v534_v37 = vpack.c.bf16 %v524_v34, %v523_v33 }
 0x230   :  { %v533_v38 = vpack.c.bf16 %v522_v36, %v521_v35  ;;  %v1011_v39 = vpop.f32.mrb[12].mxu1 }
 0x231   :  { %v507_v40 = vadd.f32 %v1011_v39, %v805_v60  ;;  %v498_v41 = vpop.f32.mrb[13].mxu1 }
 0x232   :  { %v499_v42 = vadd.f32 %v805_v60, %v498_v41  ;;  %v1012_v43 = vpop.f32.mrb[14].mxu1  ;;  %1037 = vmatprep.mubr.bf16.mxu1 %v533_v38 }
 0x233   :  { %v510_v44 = vadd.f32 %v1012_v43, %v805_v60  ;;  %v501_v45 = vpop.f32.mrb[15].mxu1  ;;  %1038 = vmatmul.mubr.bf16.vlgmr.msra.gmra.mrb[16].mxu1 %v534_v37  ;;  %v527_v47 = vmax.f32 %v507_v40, 0.0 }
 0x234   :  { %v502_v46 = vadd.f32 %v805_v60, %v501_v45  ;;  %v525_v49 = vmax.f32 %v499_v42, 0.0 }
 0x235   :  { %v528_v48 = vmax.f32 %v510_v44, 0.0 }
 0x236   :  { %v526_v50 = vmax.f32 %v502_v46, 0.0 }
 0x237   :  { %v536_v51 = vpack.c.bf16 %v528_v48, %v527_v47 }
 0x238   :  { %v535_v52 = vpack.c.bf16 %v526_v50, %v525_v49 }
 0x23a   :  { %1041 = vmatprep.mubr.bf16.mxu1 %v535_v52 }
 0x23b   :  { %1042 = vmatmul.mubr.bf16.gmra.mrb[20].mxu1 %v536_v51 }
 0x2f6   :  { %v1031_v53 = vpop.f32.mrb[16].mxu0 }
 0x2f7   :  { %v635_v54 = vpop.f32.mrb[17].mxu0 }
 0x2f8   :  { %v1032_v55 = vpop.f32.mrb[18].mxu0 }
 0x2f9   :  { %v862_v56 = vpack.c.bf16 %v1032_v55, %v1031_v53  ;;  %v638_v57 = vpop.f32.mrb[19].mxu0 }
 0x2fa   :  { %v857_v58 = vpack.c.bf16 %v638_v57, %v635_v54 }
 0x2fb   :  { %894 = vst [vmem:[#allocation11 + $0x8] sm:$0xff] %v862_v56  }
 0x2fc   :  { %858 = vst [vmem:[#allocation11] sm:$0xff] %v857_v58  }
 0x2fe   :  { %v1035_v59 = vpop.f32.mrb[20].mxu0 }
 0x2ff   :  { %v651_v61 = vpop.f32.mrb[21].mxu0 }
 0x300   :  { %v1036_v62 = vpop.f32.mrb[22].mxu0 }
 0x301   :  { %v872_v60 = vpack.c.bf16 %v1036_v62, %v1035_v59  ;;  %v654_v63 = vpop.f32.mrb[23].mxu0 }
 0x302   :  { %v867_v0 = vpack.c.bf16 %v654_v63, %v651_v61 }
 0x303   :  { %896 = vst [vmem:[#allocation11 + $0x18] sm:$0xff] %v872_v60  }
 0x304   :  { %895 = vst [vmem:[#allocation11 + $0x10] sm:$0xff] %v867_v0  }
 0x306   :  { %v1039_v1 = vpop.f32.mrb[16].mxu1 }
 0x307   :  { %v667_v2 = vpop.f32.mrb[17].mxu1 }
 0x308   :  { %v1040_v3 = vpop.f32.mrb[18].mxu1 }
 0x309   :  { %v882_v4 = vpack.c.bf16 %v1040_v3, %v1039_v1  ;;  %v670_v5 = vpop.f32.mrb[19].mxu1 }
 0x30a   :  { %v877_v6 = vpack.c.bf16 %v670_v5, %v667_v2 }
 0x30b   :  { %898 = vst [vmem:[#allocation11 + $0x28] sm:$0xff] %v882_v4  }
 0x30c   :  { %897 = vst [vmem:[#allocation11 + $0x20] sm:$0xff] %v877_v6  }
 0x30e   :  { %v1043_v7 = vpop.f32.mrb[20].mxu1 }
 0x30f   :  { %v683_v8 = vpop.f32.mrb[21].mxu1 }
 0x310   :  { %v1044_v9 = vpop.f32.mrb[22].mxu1 }
 0x311   :  { %v892_v10 = vpack.c.bf16 %v1044_v9, %v1043_v7  ;;  %v686_v11 = vpop.f32.mrb[23].mxu1 }
 0x312   :  { %v887_v12 = vpack.c.bf16 %v686_v11, %v683_v8 }
 0x313   :  { %900 = vst [vmem:[#allocation11 + $0x38] sm:$0xff] %v892_v10  }
 0x314   :  { %899 = vst [vmem:[#allocation11 + $0x30] sm:$0xff] %v887_v12  }
 0x315   :  { %1193 = shalt.err (!%p1190_p8)
}
 0x316   :  { %s1194_s23 = scalar_lea.hbm %s1338_s5, 1024 }
 0x317   :  { %p1195_p9 = scmp.ne.s32.totalorder %s1338_s5, %s1194_s23  ;;  %p1198_p10 = scmp.lt.u32.totalorder %s1194_s23, %s1338_s5 }
 0x319   :  { %p1200_p11 = pnand %p1198_p10, %p1195_p9 }
 0x31b   :  { %1203 = shalt.err (!%p1200_p11)
}
 0x31c   :  { %789 = dma.vmem_to_hbm [thread:$0]  %s784_s19, 1024, %s1338_s5, [#allocation5], %s1213_s28, %s1213_s28, %s1214_s29  }
 0x31d   :  { %1210 = dma.done.wait [#allocation5], 1024  }
 0x31e   :  { %1211 = vsyncadd [#allocation5], 4294966272 }
 0x31f   :  { %793 = vsyncpa [#allocation4], 1 }
 0x320   :  { %794 = vsyncpa [#allocation7], 1 }
 0x321   :  { %795 = vsyncpa [#allocation10], 1 }
 0x322   :  { %796 = vsyncpa [#allocation5], 1 }

</bundles_post_ra>
